<compile_context>
chip_gen: v7x
topology: tpu7x:2x2x1
jax: 0.10.0
libtpu: 0.0.40
codegen_flags: <defaults>
</compile_context>

<pallas_src>
import math

import jax
import jax.numpy as jnp
from jax.experimental import pallas as pl
from jax.experimental.pallas import tpu as pltpu


def _round_up(n, m):
    return ((n + m - 1) // m) * m


# ----------------------------------------------------------------------------
# Kernel: full coupling-layer forward for one batch tile, weights resident.
# Layout: activations are (features, TILE_B); batch rides the lane axis.
# ----------------------------------------------------------------------------
def make_coupling_kernel(n_hidden, has_cond, compute_dtype):
    n_lin = n_hidden + 2  # linear layers per sub-network

    def kernel(*refs):
        it = iter(refs)
        x_ref = next(it)                              # (D, TB)  f32
        y_ref = next(it) if has_cond else None        # (C, TB)  f32
        mask_ref = next(it)                           # (D, 1)   f32

        def read_net():
            w0x = next(it)                            # (H, D)   bf16
            w0y = next(it) if has_cond else None      # (H, C)   bf16
            b0 = next(it)                             # (H, 1)   f32
            layers = [(w0x, w0y, b0)]
            for _ in range(n_lin - 1):
                layers.append((next(it), next(it)))   # (out,in) bf16, (out,1) f32
            return layers

        s_layers = read_net()
        t_layers = read_net()
        u_ref = next(it)                              # (D, TB)  f32
        ldj_ref = next(it)                            # (D, TB)  f32

        mask = mask_ref[...]                          # (D, 1)
        x = x_ref[...]                                # (D, TB) f32
        mx = x * mask                                 # masked input, f32
        mx_c = mx.astype(compute_dtype)
        y_c = y_ref[...].astype(compute_dtype) if has_cond else None

        def run_net(layers, act):
            w0x_ref, w0y_ref, b0_ref = layers[0]
            # First layer: W0 @ [y; mx] done as two accumulating dots.
            h = jnp.dot(w0x_ref[...], mx_c, preferred_element_type=jnp.float32)
            if w0y_ref is not None:
                h = h + jnp.dot(w0y_ref[...], y_c,
                                preferred_element_type=jnp.float32)
            h = h + b0_ref[...]
            for w_ref, b_ref in layers[1:]:
                h = act(h)
                h = jnp.dot(w_ref[...], h.astype(compute_dtype),
                            preferred_element_type=jnp.float32) + b_ref[...]
            return h                                   # (D, TB) f32

        s = run_net(s_layers, jnp.tanh)
        t = run_net(t_layers, lambda v: jnp.maximum(v, 0.0))

        om = 1.0 - mask
        u_ref[...] = mx + om * (x - t) * jnp.exp(-s)
        ldj_ref[...] = -om * s

    return kernel


# ----------------------------------------------------------------------------
# Parameters (PyTorch nn.Linear layout: W is (out, in), b is (out,)).
# ----------------------------------------------------------------------------
def init_coupling_params(key, input_size, hidden_size, n_hidden, cond_label_size):
    in0 = input_size + (cond_label_size if cond_label_size is not None else 0)
    dims = [in0] + [hidden_size] * (n_hidden + 1) + [input_size]
    n_lin = n_hidden + 2

    def linear_init(k, in_f, out_f):
        kw, kb = jax.random.split(k)
        bound = 1.0 / math.sqrt(in_f)
        w = jax.random.uniform(kw, (out_f, in_f), jnp.float32, -bound, bound)
        b = jax.random.uniform(kb, (out_f,), jnp.float32, -bound, bound)
        return w, b

    keys = jax.random.split(key, 2 * n_lin)
    s_net = [linear_init(keys[i], dims[i], dims[i + 1]) for i in range(n_lin)]
    t_net = [linear_init(keys[n_lin + i], dims[i], dims[i + 1]) for i in range(n_lin)]
    return {"s": s_net, "t": t_net}


def prepare_params(params, cond_label_size, compute_dtype=jnp.bfloat16):
    """One-time prep: bf16 cast, split W0 into (cond, masked-x) halves, reshape
    biases to (out, 1).  Weights stay in PyTorch (out, in) layout — no transpose.
    Call this ONCE and reuse the result across forward calls."""
    C = cond_label_size if cond_label_size is not None else 0

    def prep(net):
        w0, b0 = net[0]
        w0 = jnp.asarray(w0, compute_dtype)                    # (H, C+D)
        w0y = w0[:, :C] if C > 0 else None                     # (H, C)
        w0x = w0[:, C:]                                        # (H, D)
        layers = [(w0x, w0y, jnp.asarray(b0, jnp.float32).reshape(-1, 1))]
        for w, b in net[1:]:
            layers.append((jnp.asarray(w, compute_dtype),
                           jnp.asarray(b, jnp.float32).reshape(-1, 1)))
        return layers

    return prep(params["s"]), prep(params["t"])


# ----------------------------------------------------------------------------
# Wrapper: layout plumbing (transpose to features x batch), tiling, pallas_call.
# ----------------------------------------------------------------------------
def coupling_forward(x, y, prepared, mask, n_hidden, *,
                     compute_dtype=jnp.bfloat16, tile_b=None):
    B, D = x.shape
    has_cond = y is not None
    C = y.shape[1] if has_cond else 0
    s_prep, t_prep = prepared
    hidden = s_prep[0][0].shape[0]

    # Batch tile: multiple of 128 so batch fully fills the lane axis.
    if tile_b is None:
        tile_b = min(512, _round_up(B, 128))
    tile_b = _round_up(tile_b, 128)
    Bp = _round_up(B, tile_b)
    nb = Bp // tile_b

    # Layout plumbing only: present activations as (features, batch).
    xT = jnp.pad(x.astype(jnp.float32).T, ((0, 0), (0, Bp - B)))
    mask_col = mask.reshape(D, 1).astype(jnp.float32)

    inputs = [xT]
    in_specs = [pl.BlockSpec((D, tile_b), lambda i: (0, i))]       # pipelined
    if has_cond:
        yT = jnp.pad(y.astype(jnp.float32).T, ((0, 0), (0, Bp - B)))
        inputs.append(yT)
        in_specs.append(pl.BlockSpec((C, tile_b), lambda i: (0, i)))  # pipelined
    inputs.append(mask_col)
    in_specs.append(pl.BlockSpec((D, 1), lambda i: (0, 0)))        # resident

    weight_bytes = 0
    for net in (s_prep, t_prep):
        w0x, w0y, b0 = net[0]
        inputs.append(w0x)
        in_specs.append(pl.BlockSpec(w0x.shape, lambda i: (0, 0)))
        weight_bytes += w0x.size * w0x.dtype.itemsize
        if has_cond:
            inputs.append(w0y)
            in_specs.append(pl.BlockSpec(w0y.shape, lambda i: (0, 0)))
            weight_bytes += w0y.size * w0y.dtype.itemsize
        inputs.append(b0)
        in_specs.append(pl.BlockSpec(b0.shape, lambda i: (0, 0)))
        weight_bytes += b0.size * 4
        for w, b in net[1:]:
            inputs.append(w)
            in_specs.append(pl.BlockSpec(w.shape, lambda i: (0, 0)))
            inputs.append(b)
            in_specs.append(pl.BlockSpec(b.shape, lambda i: (0, 0)))
            weight_bytes += w.size * w.dtype.itemsize + b.size * 4

    out_shape = (jax.ShapeDtypeStruct((D, Bp), jnp.float32),   # u   (lane-dense)
                 jax.ShapeDtypeStruct((D, Bp), jnp.float32))   # logdet
    out_specs = (pl.BlockSpec((D, tile_b), lambda i: (0, i)),
                 pl.BlockSpec((D, tile_b), lambda i: (0, i)))

    # VMEM budget: 2x resident weights (Pallas double-buffers constant-index
    # blocks), 2x double-buffered per-tile I/O, headroom for f32 activations.
    act_bytes = (D + C) * tile_b * 4
    out_bytes = 2 * D * tile_b * 4
    scratch_bytes = 4 * hidden * tile_b * 4
    vmem_limit = int(min(max(2 * weight_bytes + 2 * (act_bytes + out_bytes)
                             + scratch_bytes + (4 << 20), 16 << 20),
                         56 << 20))  # stays inside v7x's 64 MiB physical VMEM

    kernel = make_coupling_kernel(n_hidden, has_cond, compute_dtype)
    u_t, ldj_t = pl.pallas_call(
        kernel,
        grid=(nb,),
        out_shape=out_shape,
        in_specs=in_specs,
        out_specs=out_specs,
        compiler_params=pltpu.CompilerParams(
            dimension_semantics=("parallel",),
            vmem_limit_bytes=vmem_limit),
    )(*inputs)

    # Back to (B, D); padded batch columns are dropped here.
    return u_t[:, :B].T, ldj_t[:, :B].T


# ----------------------------------------------------------------------------
# Pure-JAX reference with identical numerics (same bf16 weights/activations,
# f32 accumulation, same split first layer) — correctness check only.
# ----------------------------------------------------------------------------
def coupling_forward_ref(x, y, prepared, mask, compute_dtype=jnp.bfloat16):
    s_prep, t_prep = prepared
    D = x.shape[1]
    mask_col = mask.reshape(D, 1).astype(jnp.float32)
    xT = x.astype(jnp.float32).T
    mx = xT * mask_col
    mx_c = mx.astype(compute_dtype)
    y_c = y.astype(jnp.float32).T.astype(compute_dtype) if y is not None else None

    def run(layers, act):
        w0x, w0y, b0 = layers[0]
        h = jnp.dot(w0x, mx_c, preferred_element_type=jnp.float32)
        if w0y is not None:
            h = h + jnp.dot(w0y, y_c, preferred_element_type=jnp.float32)
        h = h + b0
        for w, b in layers[1:]:
            h = act(h)
            h = jnp.dot(w, h.astype(compute_dtype),
                        preferred_element_type=jnp.float32) + b
        return h

    s = run(s_prep, jnp.tanh)
    t = run(t_prep, lambda v: jnp.maximum(v, 0.0))
    om = 1.0 - mask_col
    u = mx + om * (xT - t) * jnp.exp(-s)
    ldj = -om * s
    return u.T, ldj.T


if __name__ == "__main__":
    batch = 8
    input_size = 8
    hidden_size = 32
    n_hidden = 1
    cond_label_size = 4

    key = jax.random.PRNGKey(0)
    k_x, k_y, k_p = jax.random.split(key, 3)
    x = jax.random.normal(k_x, (batch, input_size), jnp.float32)
    y = jax.random.normal(k_y, (batch, cond_label_size), jnp.float32)
    # Alternating binary coupling mask (the module receives it as a buffer).
    mask = (jnp.arange(input_size) % 2).astype(jnp.float32)

    params = init_coupling_params(k_p, input_size, hidden_size, n_hidden,
                                  cond_label_size)
    # One-time weight prep (bf16 cast + W0 split); reused across calls.
    prepared = prepare_params(params, cond_label_size)

    u, logdet = coupling_forward(x, y, prepared, mask, n_hidden)
    jax.block_until_ready((u, logdet))

    u_ref, logdet_ref = coupling_forward_ref(x, y, prepared, mask)
    assert jnp.allclose(u, u_ref, atol=2e-3, rtol=2e-3)
    assert jnp.allclose(logdet, logdet_ref, atol=2e-3, rtol=2e-3)

    print("KERNEL_OK")
</pallas_src>

<mosaic_0001>
module attributes {stable_mosaic.version = 11 : i64} {
  func.func @kernel(%arg0: i32, %arg1: memref<8x128xf32, #tpu.memory_space<vmem>>, %arg2: memref<4x128xf32, #tpu.memory_space<vmem>>, %arg3: memref<8x1xf32, #tpu.memory_space<vmem>>, %arg4: memref<32x8xbf16, #tpu.memory_space<vmem>>, %arg5: memref<32x4xbf16, #tpu.memory_space<vmem>>, %arg6: memref<32x1xf32, #tpu.memory_space<vmem>>, %arg7: memref<32x32xbf16, #tpu.memory_space<vmem>>, %arg8: memref<32x1xf32, #tpu.memory_space<vmem>>, %arg9: memref<8x32xbf16, #tpu.memory_space<vmem>>, %arg10: memref<8x1xf32, #tpu.memory_space<vmem>>, %arg11: memref<32x8xbf16, #tpu.memory_space<vmem>>, %arg12: memref<32x4xbf16, #tpu.memory_space<vmem>>, %arg13: memref<32x1xf32, #tpu.memory_space<vmem>>, %arg14: memref<32x32xbf16, #tpu.memory_space<vmem>>, %arg15: memref<32x1xf32, #tpu.memory_space<vmem>>, %arg16: memref<8x32xbf16, #tpu.memory_space<vmem>>, %arg17: memref<8x1xf32, #tpu.memory_space<vmem>>, %arg18: memref<8x128xf32, #tpu.memory_space<vmem>>, %arg19: memref<8x128xf32, #tpu.memory_space<vmem>>) attributes {dimension_semantics = [#tpu.dimension_semantics<parallel>], iteration_bounds = array<i64: 1>, scalar_prefetch = 0 : i64, scratch_operands = 0 : i64, tpu.core_type = #tpu.core_type<tc>, window_params = [{transform_indices = @transform_0, window_bounds = array<i64: 8, 128>}, {transform_indices = @transform_1, window_bounds = array<i64: 4, 128>}, {pipeline_mode = #tpu.pipeline_mode<synchronous>, transform_indices = @transform_2, window_bounds = array<i64: 8, 1>}, {pipeline_mode = #tpu.pipeline_mode<synchronous>, transform_indices = @transform_3, window_bounds = array<i64: 32, 8>}, {pipeline_mode = #tpu.pipeline_mode<synchronous>, transform_indices = @transform_4, window_bounds = array<i64: 32, 4>}, {pipeline_mode = #tpu.pipeline_mode<synchronous>, transform_indices = @transform_5, window_bounds = array<i64: 32, 1>}, {pipeline_mode = #tpu.pipeline_mode<synchronous>, transform_indices = @transform_6, window_bounds = array<i64: 32, 32>}, {pipeline_mode = #tpu.pipeline_mode<synchronous>, transform_indices = @transform_7, window_bounds = array<i64: 32, 1>}, {pipeline_mode = #tpu.pipeline_mode<synchronous>, transform_indices = @transform_8, window_bounds = array<i64: 8, 32>}, {pipeline_mode = #tpu.pipeline_mode<synchronous>, transform_indices = @transform_9, window_bounds = array<i64: 8, 1>}, {pipeline_mode = #tpu.pipeline_mode<synchronous>, transform_indices = @transform_10, window_bounds = array<i64: 32, 8>}, {pipeline_mode = #tpu.pipeline_mode<synchronous>, transform_indices = @transform_11, window_bounds = array<i64: 32, 4>}, {pipeline_mode = #tpu.pipeline_mode<synchronous>, transform_indices = @transform_12, window_bounds = array<i64: 32, 1>}, {pipeline_mode = #tpu.pipeline_mode<synchronous>, transform_indices = @transform_13, window_bounds = array<i64: 32, 32>}, {pipeline_mode = #tpu.pipeline_mode<synchronous>, transform_indices = @transform_14, window_bounds = array<i64: 32, 1>}, {pipeline_mode = #tpu.pipeline_mode<synchronous>, transform_indices = @transform_15, window_bounds = array<i64: 8, 32>}, {pipeline_mode = #tpu.pipeline_mode<synchronous>, transform_indices = @transform_16, window_bounds = array<i64: 8, 1>}, {transform_indices = @transform_17, window_bounds = array<i64: 8, 128>}, {transform_indices = @transform_18, window_bounds = array<i64: 8, 128>}]} {
    %c0 = arith.constant 0 : index
    %c0_0 = arith.constant 0 : index
    %0 = vector.load %arg3[%c0, %c0_0] : memref<8x1xf32, #tpu.memory_space<vmem>>, vector<8x1xf32>
    %c0_1 = arith.constant 0 : index
    %c0_2 = arith.constant 0 : index
    %1 = vector.load %arg1[%c0_1, %c0_2] : memref<8x128xf32, #tpu.memory_space<vmem>>, vector<8x128xf32>
    %2 = vector.broadcast %0 : vector<8x1xf32> to vector<8x128xf32>
    %3 = arith.mulf %1, %2 : vector<8x128xf32>
    %4 = arith.truncf %3 : vector<8x128xf32> to vector<8x128xbf16>
    %c0_3 = arith.constant 0 : index
    %c0_4 = arith.constant 0 : index
    %5 = vector.load %arg2[%c0_3, %c0_4] : memref<4x128xf32, #tpu.memory_space<vmem>>, vector<4x128xf32>
    %6 = arith.truncf %5 : vector<4x128xf32> to vector<4x128xbf16>
    %c0_5 = arith.constant 0 : index
    %c0_6 = arith.constant 0 : index
    %7 = vector.load %arg4[%c0_5, %c0_6] : memref<32x8xbf16, #tpu.memory_space<vmem>>, vector<32x8xbf16>
    %cst = arith.constant dense<0.000000e+00> : vector<32x128xf32>
    %8 = tpu.matmul %7, %4, %cst {dimension_numbers = #tpu.dot_dimension_numbers<[1], [0], [0], [1], [0, 0, 1, 1], [], []>} : vector<32x8xbf16>, vector<8x128xbf16>, vector<32x128xf32> -> vector<32x128xf32>
    %c0_7 = arith.constant 0 : index
    %c0_8 = arith.constant 0 : index
    %9 = vector.load %arg5[%c0_7, %c0_8] : memref<32x4xbf16, #tpu.memory_space<vmem>>, vector<32x4xbf16>
    %cst_9 = arith.constant dense<0.000000e+00> : vector<32x128xf32>
    %10 = tpu.matmul %9, %6, %cst_9 {dimension_numbers = #tpu.dot_dimension_numbers<[1], [0], [0], [1], [0, 0, 1, 1], [], []>} : vector<32x4xbf16>, vector<4x128xbf16>, vector<32x128xf32> -> vector<32x128xf32>
    %11 = arith.addf %8, %10 : vector<32x128xf32>
    %c0_10 = arith.constant 0 : index
    %c0_11 = arith.constant 0 : index
    %12 = vector.load %arg6[%c0_10, %c0_11] : memref<32x1xf32, #tpu.memory_space<vmem>>, vector<32x1xf32>
    %13 = vector.broadcast %12 : vector<32x1xf32> to vector<32x128xf32>
    %14 = arith.addf %11, %13 : vector<32x128xf32>
    %15 = math.tanh %14 : vector<32x128xf32>
    %c0_12 = arith.constant 0 : index
    %c0_13 = arith.constant 0 : index
    %16 = vector.load %arg7[%c0_12, %c0_13] : memref<32x32xbf16, #tpu.memory_space<vmem>>, vector<32x32xbf16>
    %17 = arith.truncf %15 : vector<32x128xf32> to vector<32x128xbf16>
    %cst_14 = arith.constant dense<0.000000e+00> : vector<32x128xf32>
    %18 = tpu.matmul %16, %17, %cst_14 {dimension_numbers = #tpu.dot_dimension_numbers<[1], [0], [0], [1], [0, 0, 1, 1], [], []>} : vector<32x32xbf16>, vector<32x128xbf16>, vector<32x128xf32> -> vector<32x128xf32>
    %c0_15 = arith.constant 0 : index
    %c0_16 = arith.constant 0 : index
    %19 = vector.load %arg8[%c0_15, %c0_16] : memref<32x1xf32, #tpu.memory_space<vmem>>, vector<32x1xf32>
    %20 = vector.broadcast %19 : vector<32x1xf32> to vector<32x128xf32>
    %21 = arith.addf %18, %20 : vector<32x128xf32>
    %22 = math.tanh %21 : vector<32x128xf32>
    %c0_17 = arith.constant 0 : index
    %c0_18 = arith.constant 0 : index
    %23 = vector.load %arg9[%c0_17, %c0_18] : memref<8x32xbf16, #tpu.memory_space<vmem>>, vector<8x32xbf16>
    %24 = arith.truncf %22 : vector<32x128xf32> to vector<32x128xbf16>
    %cst_19 = arith.constant dense<0.000000e+00> : vector<8x128xf32>
    %25 = tpu.matmul %23, %24, %cst_19 {dimension_numbers = #tpu.dot_dimension_numbers<[1], [0], [0], [1], [0, 0, 1, 1], [], []>} : vector<8x32xbf16>, vector<32x128xbf16>, vector<8x128xf32> -> vector<8x128xf32>
    %c0_20 = arith.constant 0 : index
    %c0_21 = arith.constant 0 : index
    %26 = vector.load %arg10[%c0_20, %c0_21] : memref<8x1xf32, #tpu.memory_space<vmem>>, vector<8x1xf32>
    %27 = vector.broadcast %26 : vector<8x1xf32> to vector<8x128xf32>
    %28 = arith.addf %25, %27 : vector<8x128xf32>
    %c0_22 = arith.constant 0 : index
    %c0_23 = arith.constant 0 : index
    %29 = vector.load %arg11[%c0_22, %c0_23] : memref<32x8xbf16, #tpu.memory_space<vmem>>, vector<32x8xbf16>
    %cst_24 = arith.constant dense<0.000000e+00> : vector<32x128xf32>
    %30 = tpu.matmul %29, %4, %cst_24 {dimension_numbers = #tpu.dot_dimension_numbers<[1], [0], [0], [1], [0, 0, 1, 1], [], []>} : vector<32x8xbf16>, vector<8x128xbf16>, vector<32x128xf32> -> vector<32x128xf32>
    %c0_25 = arith.constant 0 : index
    %c0_26 = arith.constant 0 : index
    %31 = vector.load %arg12[%c0_25, %c0_26] : memref<32x4xbf16, #tpu.memory_space<vmem>>, vector<32x4xbf16>
    %cst_27 = arith.constant dense<0.000000e+00> : vector<32x128xf32>
    %32 = tpu.matmul %31, %6, %cst_27 {dimension_numbers = #tpu.dot_dimension_numbers<[1], [0], [0], [1], [0, 0, 1, 1], [], []>} : vector<32x4xbf16>, vector<4x128xbf16>, vector<32x128xf32> -> vector<32x128xf32>
    %33 = arith.addf %30, %32 : vector<32x128xf32>
    %c0_28 = arith.constant 0 : index
    %c0_29 = arith.constant 0 : index
    %34 = vector.load %arg13[%c0_28, %c0_29] : memref<32x1xf32, #tpu.memory_space<vmem>>, vector<32x1xf32>
    %35 = vector.broadcast %34 : vector<32x1xf32> to vector<32x128xf32>
    %36 = arith.addf %33, %35 : vector<32x128xf32>
    %cst_30 = arith.constant 0.000000e+00 : f32
    %37 = vector.broadcast %cst_30 : f32 to vector<32x128xf32>
    %38 = arith.maximumf %36, %37 : vector<32x128xf32>
    %c0_31 = arith.constant 0 : index
    %c0_32 = arith.constant 0 : index
    %39 = vector.load %arg14[%c0_31, %c0_32] : memref<32x32xbf16, #tpu.memory_space<vmem>>, vector<32x32xbf16>
    %40 = arith.truncf %38 : vector<32x128xf32> to vector<32x128xbf16>
    %cst_33 = arith.constant dense<0.000000e+00> : vector<32x128xf32>
    %41 = tpu.matmul %39, %40, %cst_33 {dimension_numbers = #tpu.dot_dimension_numbers<[1], [0], [0], [1], [0, 0, 1, 1], [], []>} : vector<32x32xbf16>, vector<32x128xbf16>, vector<32x128xf32> -> vector<32x128xf32>
    %c0_34 = arith.constant 0 : index
    %c0_35 = arith.constant 0 : index
    %42 = vector.load %arg15[%c0_34, %c0_35] : memref<32x1xf32, #tpu.memory_space<vmem>>, vector<32x1xf32>
    %43 = vector.broadcast %42 : vector<32x1xf32> to vector<32x128xf32>
    %44 = arith.addf %41, %43 : vector<32x128xf32>
    %cst_36 = arith.constant 0.000000e+00 : f32
    %45 = vector.broadcast %cst_36 : f32 to vector<32x128xf32>
    %46 = arith.maximumf %44, %45 : vector<32x128xf32>
    %c0_37 = arith.constant 0 : index
    %c0_38 = arith.constant 0 : index
    %47 = vector.load %arg16[%c0_37, %c0_38] : memref<8x32xbf16, #tpu.memory_space<vmem>>, vector<8x32xbf16>
    %48 = arith.truncf %46 : vector<32x128xf32> to vector<32x128xbf16>
    %cst_39 = arith.constant dense<0.000000e+00> : vector<8x128xf32>
    %49 = tpu.matmul %47, %48, %cst_39 {dimension_numbers = #tpu.dot_dimension_numbers<[1], [0], [0], [1], [0, 0, 1, 1], [], []>} : vector<8x32xbf16>, vector<32x128xbf16>, vector<8x128xf32> -> vector<8x128xf32>
    %c0_40 = arith.constant 0 : index
    %c0_41 = arith.constant 0 : index
    %50 = vector.load %arg17[%c0_40, %c0_41] : memref<8x1xf32, #tpu.memory_space<vmem>>, vector<8x1xf32>
    %51 = vector.broadcast %50 : vector<8x1xf32> to vector<8x128xf32>
    %52 = arith.addf %49, %51 : vector<8x128xf32>
    %cst_42 = arith.constant 1.000000e+00 : f32
    %53 = vector.broadcast %cst_42 : f32 to vector<8x1xf32>
    %54 = arith.subf %53, %0 : vector<8x1xf32>
    %55 = arith.subf %1, %52 : vector<8x128xf32>
    %56 = vector.broadcast %54 : vector<8x1xf32> to vector<8x128xf32>
    %57 = arith.mulf %56, %55 : vector<8x128xf32>
    %cst_43 = arith.constant 0.000000e+00 : f32
    %58 = vector.broadcast %cst_43 : f32 to vector<8x128xf32>
    %59 = arith.subf %58, %28 : vector<8x128xf32>
    %60 = math.exp %59 : vector<8x128xf32>
    %61 = arith.mulf %57, %60 : vector<8x128xf32>
    %62 = arith.addf %3, %61 : vector<8x128xf32>
    %c0_44 = arith.constant 0 : index
    %c0_45 = arith.constant 0 : index
    %63 = vector.load %arg18[%c0_44, %c0_45] : memref<8x128xf32, #tpu.memory_space<vmem>>, vector<8x128xf32>
    tpu.vector_store %arg18[%c0_44, %c0_45], %62 {strides = array<i32>} : memref<8x128xf32, #tpu.memory_space<vmem>>, vector<8x128xf32>,
    %cst_46 = arith.constant 0.000000e+00 : f32
    %64 = vector.broadcast %cst_46 : f32 to vector<8x1xf32>
    %65 = arith.subf %64, %54 : vector<8x1xf32>
    %66 = vector.broadcast %65 : vector<8x1xf32> to vector<8x128xf32>
    %67 = arith.mulf %66, %28 : vector<8x128xf32>
    %c0_47 = arith.constant 0 : index
    %c0_48 = arith.constant 0 : index
    %68 = vector.load %arg19[%c0_47, %c0_48] : memref<8x128xf32, #tpu.memory_space<vmem>>, vector<8x128xf32>
    tpu.vector_store %arg19[%c0_47, %c0_48], %67 {strides = array<i32>} : memref<8x128xf32, #tpu.memory_space<vmem>>, vector<8x128xf32>,
    return
  }
  func.func @transform_0(%arg0: i32) -> (i32, i32) {
    %c0_i32 = arith.constant 0 : i32
    %c0_i32_0 = arith.constant 0 : i32
    return %c0_i32, %arg0 : i32, i32
  }
  func.func @transform_1(%arg0: i32) -> (i32, i32) {
    %c0_i32 = arith.constant 0 : i32
    %c0_i32_0 = arith.constant 0 : i32
    return %c0_i32, %arg0 : i32, i32
  }
  func.func @transform_2(%arg0: i32) -> (i32, i32) {
    %c0_i32 = arith.constant 0 : i32
    %c0_i32_0 = arith.constant 0 : i32
    %c0_i32_1 = arith.constant 0 : i32
    return %c0_i32, %c0_i32_0 : i32, i32
  }
  func.func @transform_3(%arg0: i32) -> (i32, i32) {
    %c0_i32 = arith.constant 0 : i32
    %c0_i32_0 = arith.constant 0 : i32
    %c0_i32_1 = arith.constant 0 : i32
    return %c0_i32, %c0_i32_0 : i32, i32
  }
  func.func @transform_4(%arg0: i32) -> (i32, i32) {
    %c0_i32 = arith.constant 0 : i32
    %c0_i32_0 = arith.constant 0 : i32
    %c0_i32_1 = arith.constant 0 : i32
    return %c0_i32, %c0_i32_0 : i32, i32
  }
  func.func @transform_5(%arg0: i32) -> (i32, i32) {
    %c0_i32 = arith.constant 0 : i32
    %c0_i32_0 = arith.constant 0 : i32
    %c0_i32_1 = arith.constant 0 : i32
    return %c0_i32, %c0_i32_0 : i32, i32
  }
  func.func @transform_6(%arg0: i32) -> (i32, i32) {
    %c0_i32 = arith.constant 0 : i32
    %c0_i32_0 = arith.constant 0 : i32
    %c0_i32_1 = arith.constant 0 : i32
    return %c0_i32, %c0_i32_0 : i32, i32
  }
  func.func @transform_7(%arg0: i32) -> (i32, i32) {
    %c0_i32 = arith.constant 0 : i32
    %c0_i32_0 = arith.constant 0 : i32
    %c0_i32_1 = arith.constant 0 : i32
    return %c0_i32, %c0_i32_0 : i32, i32
  }
  func.func @transform_8(%arg0: i32) -> (i32, i32) {
    %c0_i32 = arith.constant 0 : i32
    %c0_i32_0 = arith.constant 0 : i32
    %c0_i32_1 = arith.constant 0 : i32
    return %c0_i32, %c0_i32_0 : i32, i32
  }
  func.func @transform_9(%arg0: i32) -> (i32, i32) {
    %c0_i32 = arith.constant 0 : i32
    %c0_i32_0 = arith.constant 0 : i32
    %c0_i32_1 = arith.constant 0 : i32
    return %c0_i32, %c0_i32_0 : i32, i32
  }
  func.func @transform_10(%arg0: i32) -> (i32, i32) {
    %c0_i32 = arith.constant 0 : i32
    %c0_i32_0 = arith.constant 0 : i32
    %c0_i32_1 = arith.constant 0 : i32
    return %c0_i32, %c0_i32_0 : i32, i32
  }
  func.func @transform_11(%arg0: i32) -> (i32, i32) {
    %c0_i32 = arith.constant 0 : i32
    %c0_i32_0 = arith.constant 0 : i32
    %c0_i32_1 = arith.constant 0 : i32
    return %c0_i32, %c0_i32_0 : i32, i32
  }
  func.func @transform_12(%arg0: i32) -> (i32, i32) {
    %c0_i32 = arith.constant 0 : i32
    %c0_i32_0 = arith.constant 0 : i32
    %c0_i32_1 = arith.constant 0 : i32
    return %c0_i32, %c0_i32_0 : i32, i32
  }
  func.func @transform_13(%arg0: i32) -> (i32, i32) {
    %c0_i32 = arith.constant 0 : i32
    %c0_i32_0 = arith.constant 0 : i32
    %c0_i32_1 = arith.constant 0 : i32
    return %c0_i32, %c0_i32_0 : i32, i32
  }
  func.func @transform_14(%arg0: i32) -> (i32, i32) {
    %c0_i32 = arith.constant 0 : i32
    %c0_i32_0 = arith.constant 0 : i32
    %c0_i32_1 = arith.constant 0 : i32
    return %c0_i32, %c0_i32_0 : i32, i32
  }
  func.func @transform_15(%arg0: i32) -> (i32, i32) {
    %c0_i32 = arith.constant 0 : i32
    %c0_i32_0 = arith.constant 0 : i32
    %c0_i32_1 = arith.constant 0 : i32
    return %c0_i32, %c0_i32_0 : i32, i32
  }
  func.func @transform_16(%arg0: i32) -> (i32, i32) {
    %c0_i32 = arith.constant 0 : i32
    %c0_i32_0 = arith.constant 0 : i32
    %c0_i32_1 = arith.constant 0 : i32
    return %c0_i32, %c0_i32_0 : i32, i32
  }
  func.func @transform_17(%arg0: i32) -> (i32, i32) {
    %c0_i32 = arith.constant 0 : i32
    %c0_i32_0 = arith.constant 0 : i32
    return %c0_i32, %arg0 : i32, i32
  }
  func.func @transform_18(%arg0: i32) -> (i32, i32) {
    %c0_i32 = arith.constant 0 : i32
    %c0_i32_0 = arith.constant 0 : i32
    return %c0_i32, %arg0 : i32, i32
  }
}

</mosaic_0001>

<bundles_post_ra>
// kernel: tpu_custom_call.1
= control target key start
LH: loop header
LB: loop body
LE: loop exit
PB: predicated region body
PF: predicated region fallthrough
CT: control target
= control target key end

     0   :  { %s1243_s0 = inlined_call_operand.vmem [shape: f32[8,128], index: 0, kind: input, shape index: {}]   ;;  %s1244_s1 = inlined_call_operand.vmem [shape: f32[4,128], index: 1, kind: input, shape index: {}]   ;;  %s1245_s2 = inlined_call_operand.vmem [shape: f32[8,1], index: 2, kind: input, shape index: {}]   ;;  %s1246_s3 = inlined_call_operand.vmem [shape: bf16[32,8], index: 3, kind: input, shape index: {}]   ;;  %s1247_s4 = inlined_call_operand.vmem [shape: bf16[32,4], index: 4, kind: input, shape index: {}]   ;;  %s1248_s5 = inlined_call_operand.vmem [shape: f32[32,1], index: 5, kind: input, shape index: {}]   ;;  %s1249_s6 = inlined_call_operand.vmem [shape: bf16[32,32], index: 6, kind: input, shape index: {}]   ;;  %s1250_s7 = inlined_call_operand.vmem [shape: f32[32,1], index: 7, kind: input, shape index: {}]   ;;  %s1251_s8 = inlined_call_operand.vmem [shape: bf16[8,32], index: 8, kind: input, shape index: {}]   ;;  %s1252_s9 = inlined_call_operand.vmem [shape: f32[8,1], index: 9, kind: input, shape index: {}]   ;;  %s1253_s10 = inlined_call_operand.vmem [shape: bf16[32,8], index: 10, kind: input, shape index: {}]   ;;  %s1254_s11 = inlined_call_operand.vmem [shape: bf16[32,4], index: 11, kind: input, shape index: {}]   ;;  %s1255_s12 = inlined_call_operand.vmem [shape: f32[32,1], index: 12, kind: input, shape index: {}]   ;;  %s1256_s13 = inlined_call_operand.vmem [shape: bf16[32,32], index: 13, kind: input, shape index: {}]   ;;  %s1257_s14 = inlined_call_operand.vmem [shape: f32[32,1], index: 14, kind: input, shape index: {}]   ;;  %s1258_s15 = inlined_call_operand.vmem [shape: bf16[8,32], index: 15, kind: input, shape index: {}]   ;;  %s1259_s16 = inlined_call_operand.vmem [shape: f32[8,1], index: 16, kind: input, shape index: {}]   ;;  %s1260_s17 = inlined_call_operand.hbm [shape: f32[8,128], index: 17, kind: output, shape index: {0}]   ;;  %s1261_s18 = inlined_call_operand.hbm [shape: f32[8,128], index: 18, kind: output, shape index: {1}]  }
   0x1   :  { %1262 = sst [smem:[#allocation8_spill]] %s1243_s0 }
   0x2   :  { %1263 = sst [smem:[#allocation9_spill]] %s1244_s1 }
   0x3   :  { %1264 = sst [smem:[#allocation10_spill]] %s1245_s2 }
   0x4   :  { %24 = vsyncpa [#allocation3], 0  ;;  %s1265_s29 = sld [smem:[#allocation10_spill]]  ;;  %v980_v1 = vmov 0   ;;  %v220_v2 = vld [vmem:[%s1248_s5] sm:$0xff]  ;;  %s1266_s20 = sld [smem:[#allocation9_spill]] }
   0x5   :  { %900 = vset.pattern.permute.xlu0 %v980_v1  ;;  %901 = vset.pattern.permute.xlu1 %v980_v1  ;;  %vm97_vm0 = vcmask 1041408   ;;  %v902_v5 = vld [vmem:[%s1247_s4] sm:$0xff]   ;;  %vm90_vm1 = vcmask 31744   ;;  %v223_v6 = vld [vmem:[%s1248_s5 + $0x18] sm:$0xff]  ;;  %v903_v8 = vld [vmem:[%s1247_s4 + $0x8] sm:$0xff]   ;;  %vm160_vm2 = vcmask 64512  }
   0x6   :  { %829 = vmatprep.mubr.msk.bf16.mxu0 %vm90_vm1, %v902_v5  ;;  %v904_v9 = vld [vmem:[%s1246_s3] sm:$0xff]   ;;  %v259_v10 = vld [vmem:[%s1250_s7 + $0x8] sm:$0xff] }
   0xa   :  { %v61_v0 = vld [vmem:[%s1265_s29] sm:$0xff] }
   0xb   :  { %65 = vperm.xlu0 %900, %v61_v0   ;;  %v70_v3 = vld [vmem:[%s1266_s20] sm:$0xf] }
   0xc   :  { %v71_v4 = vpack.c.bf16 %v70_v3, %v70_v3 }
   0xe   :  { %891 = vmatprep.subr.msk.bf16.mxu0 %vm97_vm0, %v71_v4  ;;  %v99_v7 = vsel %vm97_vm0, %v71_v4, 0 }
   0xf   :  { %226 = vperm.xlu0 %900, %v220_v2   ;;  %828 = vmatpush3.bf16.msra.mxu0 %v99_v7 }
  0x12   :  { %830 = vmatmul.mubr.msk.bf16.vlgmr.msra.gmra.mrb[0].mxu0 %vm90_vm1, %v903_v8 }
  0x13   :  { %241 = vperm.xlu0 %900, %v223_v6   ;;  %835 = vmatprep.mubr.msk.bf16.mxu0 %vm160_vm2, %v904_v9 }
  0x17   :  { %269 = vperm.xlu0 %900, %v259_v10  }
  0x18   :  { %25 = vsyncpa [#allocation5], 0  ;;  %v261_v11 = vld [vmem:[%s1250_s7 + $0x18] sm:$0xff]  ;;  %v543_v12 = vld [vmem:[%s1255_s12 + $0x8] sm:$0xff]  ;;  %v725_v16 = vsub.f32 1.0, %v61_v0  ;;  %vm167_vm3 = vcmask 1043456  }
  0x19   :  { %v545_v13 = vld [vmem:[%s1255_s12 + $0x18] sm:$0xff]  ;;  %v581_v14 = vld [vmem:[%s1257_s14 + $0x8] sm:$0xff]  ;;  %v676_v17 = vld [vmem:[%s1259_s16] sm:$0xff]  ;;  %vm292_vm4 = vcmask 261120   ;;  %vm982_vm5 = vmmov 0   ;;  %s983_s23 = smov [#allocation4]  }
  0x1a   :  { %v583_v15 = vld [vmem:[%s1257_s14 + $0x18] sm:$0xff]  ;;  %v739_v18 = vsub.f32 0.0, %v725_v16  ;;  %v221_v19 = vld [vmem:[%s1248_s5 + $0x8] sm:$0xff]  ;;  %v222_v20 = vld [vmem:[%s1248_s5 + $0x10] sm:$0xff] }
  0x1b   :  { %279 = vperm.xlu0 %900, %v261_v11   ;;  %231 = vperm.xlu1 %901, %v221_v19   ;;  %v258_v21 = vld [vmem:[%s1250_s7] sm:$0xff]  ;;  %v260_v22 = vld [vmem:[%s1250_s7 + $0x10] sm:$0xff]  ;;  %v905_v33 = vld [vmem:[%s1246_s3 + $0x8] sm:$0xff]   ;;  %s763_s7 = sshll.u32 %s983_s23, 4  ;;  %s764_s7 = int_to_ptr.vmem [resolvable:$true] %s763_s7 }
  0x1c   :  { %v542_v23 = vld [vmem:[%s1255_s12] sm:$0xff]  ;;  %v544_v24 = vld [vmem:[%s1255_s12 + $0x10] sm:$0xff]  ;;  %s1267_s12 = sld [smem:[#allocation8_spill]]  ;;  %v907_v35 = vld [vmem:[%s1254_s11 + $0x8] sm:$0xff]   ;;  %s932_s24 = scalar_lea.vmem %s764_s7, 128 }
  0x1d   :  { %v580_v25 = vld [vmem:[%s1257_s14] sm:$0xff]  ;;  %v582_v26 = vld [vmem:[%s1257_s14 + $0x10] sm:$0xff]  ;;  %v909_v37 = vld [vmem:[%s1253_s10 + $0x8] sm:$0xff]   ;;  %p933_p0 = scmp.ne.s32.totalorder %s764_s7, %s932_s24  ;;  %p937_p1 = scmp.lt.s32.totalorder %s764_s7, %s764_s7 }
  0x1e   :  { %v355_v27 = vld [vmem:[%s1252_s9] sm:$0xff]  ;;  %v911_v8 = vld [vmem:[%s1249_s6 + $0x8] sm:$0xff]   ;;  %p938_p2 = scmp.lt.s32.totalorder %s932_s24, %s932_s24 }
  0x1f   :  { %553 = vperm.xlu0 %900, %v543_v12   ;;  %236 = vperm.xlu1 %901, %v222_v20   ;;  %v906_v34 = vld [vmem:[%s1254_s11] sm:$0xff]  }
  0x20   :  { %v908_v36 = vld [vmem:[%s1253_s10] sm:$0xff]   ;;  %p939_p3 = por %p938_p2, %p937_p1 }
  0x21   :  { %v910_v38 = vld [vmem:[%s1249_s6] sm:$0xff]  }
  0x22   :  { %v1157_v28 = vld [vmem:[%s1267_s12] sm:$0xff]  ;;  %843 = vmatprep.mubr.msk.bf16.mxu1 %vm292_vm4, %v910_v38  ;;  %p940_p4 = pnand %p939_p3, %p933_p0 }
  0x23   :  { %563 = vperm.xlu0 %900, %v545_v13   ;;  %264 = vperm.xlu1 %901, %v258_v21  }
  0x27   :  { %591 = vperm.xlu0 %900, %v581_v14   ;;  %274 = vperm.xlu1 %901, %v260_v22  }
  0x2b   :  { %601 = vperm.xlu0 %900, %v583_v15   ;;  %548 = vperm.xlu1 %901, %v542_v23  }
  0x2f   :  { %679 = vperm.xlu0 %900, %v676_v17   ;;  %558 = vperm.xlu1 %901, %v544_v24  }
  0x33   :  { %742 = vperm.xlu0 %900, %v739_v18   ;;  %586 = vperm.xlu1 %901, %v580_v25  }
  0x37   :  { %596 = vperm.xlu1 %901, %v582_v26  }
  0x3b   :  { %358 = vperm.xlu1 %901, %v355_v27  }
  0x3f   :  { %729 = vperm.xlu1 %901, %v725_v16   ;;  %v981_v16 = vmov 0.0  }
  0x8a   :  { %v66_v29 = vpop.permute.xlu0 %65 }
  0x8b   :  { %v1160_v30 = vmul.f32 %v66_v29, %v1157_v28 }
  0x8d   :  { %v69_v31 = vpack.c.bf16 %v1160_v30, %v1160_v30 }
  0x8e   :  { %v227_v40 = vpop.permute.xlu0 %226 }
  0x8f   :  { %892 = vmatprep.subr.msk.bf16.mxu0 %vm167_vm3, %v69_v31  ;;  %v169_v32 = vsel %vm167_vm3, %v69_v31, 0 }
  0x90   :  { %834 = vmatpush3.bf16.msra.mxu0 %v169_v32 }
  0x91   :  { %893 = vmatprep.subr.msk.bf16.mxu0 %vm97_vm0, %v71_v4 }
  0x92   :  { %v242_v42 = vpop.permute.xlu0 %241 }
  0x93   :  { %836 = vmatmul.mubr.msk.bf16.vlgmr.msra.gmra.mrb[0].mxu0 %vm160_vm2, %v905_v33  ;;  %v352_v33 = vld [vmem:[%s1251_s8] sm:$0xf] }
  0x94   :  { %856 = vmatpush3.bf16.msra.mxu0 %v99_v7  ;;  %857 = vmatprep.mubr.msk.bf16.mxu0 %vm90_vm1, %v906_v34  ;;  %v912_v34 = vld [vmem:[%s1256_s13] sm:$0xff]  }
  0x95   :  { %894 = vmatprep.subr.msk.bf16.mxu0 %vm167_vm3, %v69_v31 }
  0x96   :  { %v270_v51 = vpop.permute.xlu0 %269 }
  0x9a   :  { %v232_v39 = vpop.permute.xlu1 %231  ;;  %v280_v54 = vpop.permute.xlu0 %279 }
  0x9b   :  { %858 = vmatmul.mubr.msk.bf16.vlgmr.msra.gmra.mrb[4].mxu0 %vm90_vm1, %v907_v35  ;;  %v913_v35 = vld [vmem:[%s1256_s13 + $0x8] sm:$0xff]  }
  0x9c   :  { %862 = vmatpush3.bf16.msra.mxu0 %v169_v32  ;;  %863 = vmatprep.mubr.msk.bf16.mxu0 %vm160_vm2, %v908_v36 }
  0x9e   :  { %v237_v41 = vpop.permute.xlu1 %236  ;;  %v554_v60 = vpop.permute.xlu0 %553 }
  0xa2   :  { %v265_v46 = vpop.permute.xlu1 %264  ;;  %v564_v3 = vpop.permute.xlu0 %563 }
  0xa6   :  { %v275_v53 = vpop.permute.xlu1 %274  ;;  %v592_v36 = vpop.permute.xlu0 %591 }
  0xa7   :  { %864 = vmatmul.mubr.msk.bf16.vlgmr.msra.gmra.mrb[4].mxu0 %vm160_vm2, %v909_v37 }
  0xaa   :  { %v549_v57 = vpop.permute.xlu1 %548  ;;  %v602_v38 = vpop.permute.xlu0 %601 }
  0xae   :  { %v559_v63 = vpop.permute.xlu1 %558 }
  0xb2   :  { %v587_v37 = vpop.permute.xlu1 %586 }
 0x166   :  { %v837_v43 = vpop.f32.mrb[0].mxu0 }
 0x167   :  { %v246_v44 = vadd.f32 %v837_v43, %v237_v41  ;;  %v205_v45 = vpop.f32.mrb[1].mxu0 }
 0x168   :  { %v244_v47 = vadd.f32 %v227_v40, %v205_v45  ;;  %v838_v48 = vpop.f32.mrb[2].mxu0  ;;  %v680_v40 = vpop.permute.xlu0 %679 }
 0x169   :  { %914 = vtanh.f32 %v246_v44  ;;  %v247_v49 = vadd.f32 %v838_v48, %v242_v42  ;;  %v208_v50 = vpop.f32.mrb[3].mxu0 }
 0x16a   :  { %916 = vtanh.f32 %v244_v47  ;;  %v245_v52 = vadd.f32 %v232_v39, %v208_v50  ;;  %v597_v39 = vpop.permute.xlu1 %596 }
 0x16b   :  { %918 = vtanh.f32 %v247_v49 }
 0x16c   :  { %920 = vtanh.f32 %v245_v52  ;;  %v743_v45 = vpop.permute.xlu0 %742 }
 0x16e   :  { %v359_v41 = vpop.permute.xlu1 %358 }
 0x173   :  { %v915_v55 = vpop.eup %914 }
 0x174   :  { %v917_v56 = vpop.eup %916 }
 0x175   :  { %v919_v58 = vpop.eup %918 }
 0x176   :  { %v921_v59 = vpop.eup %920  ;;  %v257_v61 = vpack.c.bf16 %v919_v58, %v915_v55 }
 0x177   :  { %v256_v62 = vpack.c.bf16 %v921_v59, %v917_v56 }
 0x179   :  { %839 = vmatprep.subr.bf16.mxu1 %v256_v62 }
 0x17a   :  { %840 = vmatpush3.bf16.msra.mxu1 %v256_v62  ;;  %v865_v0 = vpop.f32.mrb[4].mxu0 }
 0x17b   :  { %v568_v1 = vadd.f32 %v865_v0, %v559_v63  ;;  %841 = vmatprep.subr.bf16.mxu1 %v257_v61  ;;  %v527_v2 = vpop.f32.mrb[5].mxu0  ;;  %v673_v63 = vld [vmem:[%s1258_s15] sm:$0xf] }
 0x17c   :  { %v566_v4 = vadd.f32 %v549_v57, %v527_v2  ;;  %v866_v5 = vpop.f32.mrb[6].mxu0 }
 0x17d   :  { %v569_v6 = vadd.f32 %v866_v5, %v564_v3  ;;  %v530_v7 = vpop.f32.mrb[7].mxu0  ;;  %v572_v10 = vmax.f32 %v568_v1, 0.0 }
 0x17e   :  { %v567_v9 = vadd.f32 %v554_v60, %v530_v7  ;;  %842 = vmatpush3.bf16.msra.mxu1 %v257_v61  ;;  %v570_v12 = vmax.f32 %v566_v4, 0.0 }
 0x17f   :  { %v573_v11 = vmax.f32 %v569_v6, 0.0  ;;  %847 = vmatprep.subr.bf16.mxu1 %v981_v16 }
 0x180   :  { %v571_v13 = vmax.f32 %v567_v9, 0.0 }
 0x181   :  { %v579_v14 = vpack.c.bf16 %v573_v11, %v572_v10  ;;  %844 = vmatmul.mubr.msk.bf16.vlgmr.msra.gmra.mrb[0].mxu1 %vm292_vm4, %v911_v8 }
 0x182   :  { %v578_v15 = vpack.c.bf16 %v571_v13, %v570_v12  ;;  %851 = vmatprep.mubr.msk.bf16.mxu1 %vm982_vm5, %v981_v16 }
 0x254   :  { %v845_v17 = vpop.f32.mrb[0].mxu1 }
 0x255   :  { %v342_v18 = vadd.f32 %v845_v17, %v275_v53  ;;  %v333_v19 = vpop.f32.mrb[1].mxu1 }
 0x256   :  { %v334_v20 = vadd.f32 %v333_v19, %v265_v46  ;;  %v846_v21 = vpop.f32.mrb[2].mxu1 }
 0x257   :  { %922 = vtanh.f32 %v342_v18  ;;  %v345_v22 = vadd.f32 %v846_v21, %v280_v54  ;;  %v336_v23 = vpop.f32.mrb[3].mxu1 }
 0x258   :  { %924 = vtanh.f32 %v334_v20  ;;  %v337_v24 = vadd.f32 %v336_v23, %v270_v51 }
 0x259   :  { %926 = vtanh.f32 %v345_v22 }
 0x25a   :  { %928 = vtanh.f32 %v337_v24 }
 0x261   :  { %v923_v25 = vpop.eup %922 }
 0x262   :  { %v925_v26 = vpop.eup %924 }
 0x263   :  { %v927_v27 = vpop.eup %926 }
 0x264   :  { %v929_v29 = vpop.eup %928  ;;  %v354_v31 = vpack.c.bf16 %v927_v27, %v923_v25 }
 0x265   :  { %v353_v32 = vpack.c.bf16 %v929_v29, %v925_v26 }
 0x267   :  { %848 = vmatpush3.bf16.msra.mxu1 %v353_v32 }
 0x268   :  { %849 = vmatprep.subr.bf16.mxu1 %v981_v16 }
 0x26b   :  { %850 = vmatpush3.bf16.msra.mxu1 %v354_v31 }
 0x26c   :  { %867 = vmatprep.subr.bf16.mxu1 %v578_v15 }
 0x26e   :  { %852 = vmatmul.mubr.msk.bf16.vlgmr.msra.gmra.mrb[4].mxu1 %vm292_vm4, %v352_v33 }
 0x26f   :  { %868 = vmatpush3.bf16.msra.mxu1 %v578_v15  ;;  %871 = vmatprep.mubr.msk.bf16.mxu1 %vm292_vm4, %v912_v34 }
 0x270   :  { %869 = vmatprep.subr.bf16.mxu1 %v579_v14 }
 0x273   :  { %870 = vmatpush3.bf16.msra.mxu1 %v579_v14 }
 0x274   :  { %875 = vmatprep.subr.bf16.mxu1 %v981_v16 }
 0x276   :  { %872 = vmatmul.mubr.msk.bf16.vlgmr.msra.gmra.mrb[8].mxu1 %vm292_vm4, %v913_v35 }
 0x277   :  { %879 = vmatprep.mubr.msk.bf16.mxu1 %vm982_vm5, %v981_v16 }
 0x341   :  { %v398_v42 = vpop.f32.mrb[4].mxu1 }
 0x342   :  { %v399_v43 = vadd.f32 %v398_v42, %v359_v41  ;;  %v853_v44 = vpop.f32.mrb[5].mxu1 }
 0x343   :  { %v401_v46 = vpop.f32.mrb[6].mxu1 }
 0x344   :  { %v854_v47 = vpop.f32.mrb[7].mxu1  ;;  %v745_v48 = vmul.f32 %v743_v45, %v399_v43 }
 0x346   :  { %746 = vst [vmem:[#allocation4] sm:$0xff] %v745_v48 }
 0x349   :  { %v873_v49 = vpop.f32.mrb[8].mxu1 }
 0x34a   :  { %v663_v50 = vadd.f32 %v873_v49, %v597_v39  ;;  %v654_v51 = vpop.f32.mrb[9].mxu1 }
 0x34b   :  { %v655_v52 = vadd.f32 %v654_v51, %v587_v37  ;;  %v874_v53 = vpop.f32.mrb[10].mxu1 }
 0x34c   :  { %v666_v54 = vadd.f32 %v874_v53, %v602_v38  ;;  %v657_v55 = vpop.f32.mrb[11].mxu1  ;;  %v671_v57 = vmax.f32 %v663_v50, 0.0 }
 0x34d   :  { %v658_v56 = vadd.f32 %v657_v55, %v592_v36  ;;  %v669_v59 = vmax.f32 %v655_v52, 0.0 }
 0x34e   :  { %v672_v58 = vmax.f32 %v666_v54, 0.0 }
 0x34f   :  { %v670_v60 = vmax.f32 %v658_v56, 0.0 }
 0x350   :  { %v675_v61 = vpack.c.bf16 %v672_v58, %v671_v57 }
 0x351   :  { %v674_v62 = vpack.c.bf16 %v670_v60, %v669_v59 }
 0x353   :  { %876 = vmatpush3.bf16.msra.mxu1 %v674_v62 }
 0x354   :  { %877 = vmatprep.subr.bf16.mxu1 %v981_v16 }
 0x357   :  { %878 = vmatpush3.bf16.msra.mxu1 %v675_v61 }
 0x35a   :  { %880 = vmatmul.mubr.msk.bf16.vlgmr.msra.gmra.mrb[12].mxu1 %vm292_vm4, %v673_v63 }
 0x35b   :  { %943 = shalt.err (!%p940_p4)
}
 0x35c   :  { %s944_s12 = scalar_lea.hbm %s1261_s18, 128 }
 0x35d   :  { %p945_p5 = scmp.ne.s32.totalorder %s1261_s18, %s944_s12  ;;  %p948_p6 = scmp.lt.u32.totalorder %s944_s12, %s1261_s18 }
 0x35f   :  { %p950_p7 = pnand %p948_p6, %p945_p5 }
 0x361   :  { %953 = shalt.err (!%p950_p7)
}
 0x362   :  { %766 = dma.vmem_to_hbm [thread:$0]  %s764_s7, 128, %s1261_s18, [#allocation5]   ;;  %v733_v0 = vsub.f32 0.0, %v399_v43  ;;  %v730_v8 = vpop.permute.xlu1 %729 }
 0x363   :  { %s984_s4 = smov [#allocation2]  }
 0x364   :  { %v734_v1 = vmul.f32 1.442695, %v733_v0  ;;  %s753_s30 = sshll.u32 %s984_s4, 4  ;;  %s754_s30 = int_to_ptr.vmem [resolvable:$true] %s753_s30 }
 0x365   :  { %s954_s18 = scalar_lea.vmem %s754_s30, 128  ;;  %p959_p9 = scmp.lt.s32.totalorder %s754_s30, %s754_s30 }
 0x366   :  { %930 = vpow2.f32 %v734_v1  ;;  %p955_p8 = scmp.ne.s32.totalorder %s754_s30, %s954_s18  ;;  %p960_p10 = scmp.lt.s32.totalorder %s954_s18, %s954_s18 }
 0x368   :  { %p961_p11 = por %p960_p10, %p959_p9 }
 0x36a   :  { %p962_p12 = pnand %p961_p11, %p955_p8 }
 0x370   :  { %v931_v10 = vpop.eup %930 }
 0x42d   :  { %v719_v2 = vpop.f32.mrb[12].mxu1 }
 0x42e   :  { %v720_v3 = vadd.f32 %v719_v2, %v680_v40  ;;  %v881_v4 = vpop.f32.mrb[13].mxu1 }
 0x42f   :  { %v722_v5 = vpop.f32.mrb[14].mxu1 }
 0x430   :  { %v726_v6 = vsub.f32 %v1157_v28, %v720_v3  ;;  %v882_v7 = vpop.f32.mrb[15].mxu1 }
 0x432   :  { %v732_v9 = vmul.f32 %v730_v8, %v726_v6 }
 0x434   :  { %v736_v11 = vmul.f32 %v931_v10, %v732_v9 }
 0x436   :  { %v737_v12 = vadd.f32 %v736_v11, %v1160_v30 }
 0x438   :  { %738 = vst [vmem:[#allocation2] sm:$0xff] %v737_v12 }
 0x439   :  { %965 = shalt.err (!%p962_p12)
}
 0x43a   :  { %s966_s16 = scalar_lea.hbm %s1260_s17, 128 }
 0x43b   :  { %p967_p13 = scmp.ne.s32.totalorder %s1260_s17, %s966_s16  ;;  %p970_p0 = scmp.lt.u32.totalorder %s966_s16, %s1260_s17 }
 0x43d   :  { %p972_p1 = pnand %p970_p0, %p967_p13 }
 0x43f   :  { %975 = shalt.err (!%p972_p1)
}
 0x440   :  { %756 = dma.vmem_to_hbm [thread:$0]  %s754_s30, 128, %s1260_s17, [#allocation3]  }
 0x441   :  { %976 = dma.done.wait [#allocation3], 128  }
 0x442   :  { %977 = vsyncadd [#allocation3], 4294967168 }
 0x443   :  { %978 = dma.done.wait [#allocation5], 128  }
 0x444   :  { %979 = vsyncadd [#allocation5], 4294967168 }
 0x445   :  { %773 = vsyncpa [#allocation3], 1 }
 0x446   :  { %774 = vsyncpa [#allocation5], 1 }

</bundles_post_ra>
